<compile_context>
chip_gen: v6e
topology: v6e:2x2x1
jax: 0.10.0
libtpu: 0.0.40
codegen_flags: <defaults>
</compile_context>

<pallas_src>
import functools
import math

import jax
import jax.numpy as jnp
from jax.experimental import pallas as pl
from jax.experimental.pallas import tpu as pltpu


# Contract the last dim of x with the last dim of W (W in PyTorch (out, in)
# layout) => x @ W.T, without materializing any transpose.
_CONTRACT_LAST = (((1,), (1,)), ((), ()))


def _layernorm_f32(x, gamma, beta, eps=1e-6):
    # x: (rows, head_dim) f32; gamma/beta: (1, head_dim) f32
    mean = jnp.mean(x, axis=-1, keepdims=True)
    xc = x - mean
    var = jnp.mean(xc * xc, axis=-1, keepdims=True)
    return xc * jax.lax.rsqrt(var + eps) * gamma + beta


def _vmem_capacity_bytes():
    """Physical VMEM capacity (generation-aware), with a conservative fallback."""
    try:
        cap = int(getattr(pltpu.get_tpu_info(), "vmem_capacity_bytes", 0))
        if cap > 0:
            return cap
    except Exception:
        pass
    return 64 << 20  # conservative: v7x per-TensorCore VMEM


def _vmem_limit(est_bytes, capacity):
    limit = max(int(est_bytes * 1.4) + (8 << 20), 32 << 20)
    return int(min(limit, capacity - (4 << 20)))


def _pick_seq_tile(s, vmem_capacity):
    """Query-sequence tile: multiple of 128, 512 on 128-MiB chips, 256 on v7x."""
    target = 512 if vmem_capacity >= (96 << 20) else 256
    if s <= target:
        return s                              # full-extent block (always legal)
    for t in range(target, 127, -128):        # largest 128-multiple dividing s
        if s % t == 0:
            return t
    return target                             # non-dividing: last tile padded/masked


def _const_spec(shape, grid_ndim):
    """Grid-invariant (replicated) operand, single-buffered when supported."""
    zeros = (0,) * len(shape)
    imap = (lambda _i: zeros) if grid_ndim == 1 else (lambda _i, _j: zeros)
    try:
        return pl.BlockSpec(shape, imap, pipeline_mode=pl.Buffered(1))
    except (TypeError, AttributeError):       # older jax: no pipeline_mode kwarg
        return pl.BlockSpec(shape, imap)


# --------------------------------------------------------------------------- #
# Kernel 1: KV projection + per-head K LayerNorm (once per batch element).
# --------------------------------------------------------------------------- #
def _kv_proj_kernel(y_ref, wk_ref, bk_ref, wv_ref, bv_ref, knw_ref, knb_ref,
                    k_ref, v_ref, *, num_heads, head_dim):
    cdt = y_ref.dtype
    y = y_ref[...]                                                  # (S1, kdim)

    # V projection straight to its output (no norm on V).
    v = jax.lax.dot_general(y, wv_ref[...], _CONTRACT_LAST,
                            preferred_element_type=jnp.float32) + bv_ref[...]
    v_ref[...] = v.astype(cdt)

    # K projection + per-head LayerNorm; the 1/sqrt(head_dim) attention scale
    # is already folded into knw/knb by the wrapper.
    k = jax.lax.dot_general(y, wk_ref[...], _CONTRACT_LAST,
                            preferred_element_type=jnp.float32) + bk_ref[...]
    knw = knw_ref[...]
    knb = knb_ref[...]
    # TODO(synk): for head_dim < 128, process heads in pairs per 128-lane group
    # so these column writes stay lane-dense (unmasked vst).
    for h in range(num_heads):
        lo = h * head_dim
        k_ref[:, lo:lo + head_dim] = _layernorm_f32(
            k[:, lo:lo + head_dim], knw, knb).astype(cdt)


# --------------------------------------------------------------------------- #
# Kernel 2: per query tile — q proj, per-head q LN, attention, out proj.
# --------------------------------------------------------------------------- #
def _attn_kernel(x_ref, k_ref, v_ref, wq_ref, bq_ref, qnw_ref, qnb_ref,
                 wo_ref, bo_ref, o_ref, ctx_scr,
                 *, num_heads, head_dim, approx_recip):
    cdt = x_ref.dtype
    x = x_ref[...]                                                  # (tS, qdim)
    q = jax.lax.dot_general(x, wq_ref[...], _CONTRACT_LAST,
                            preferred_element_type=jnp.float32) + bq_ref[...]
    qnw = qnw_ref[...]                      # hoisted out of the head loop
    qnb = qnb_ref[...]

    # Heads write disjoint static column slices of ctx_scr so only one head's
    # temporaries are live at a time.
    # TODO(synk): for num_heads >= 8 switch to lax.fori_loop(unroll=2) with
    # pl.ds slices to bound per-head vreg live ranges.
    for h in range(num_heads):
        lo = h * head_dim
        qh = _layernorm_f32(q[:, lo:lo + head_dim], qnw, qnb).astype(cdt)
        kh = k_ref[:, lo:lo + head_dim]     # (S1, hd), pre-normed + pre-scaled
        vh = v_ref[:, lo:lo + head_dim]     # (S1, hd)
        # scores: contract head_dim of both operands (standard flash pattern).
        s = jax.lax.dot_general(qh, kh, _CONTRACT_LAST,
                                preferred_element_type=jnp.float32)  # (tS, S1)
        m = jnp.max(s, axis=-1, keepdims=True)
        p = jnp.exp(s - m)
        denom = jnp.sum(p, axis=-1, keepdims=True)
        # Deferred normalization: scale the (tS, hd) context, not (tS, S1) p.
        ctx_h = jnp.dot(p.astype(cdt), vh,
                        preferred_element_type=jnp.float32)          # (tS, hd)
        if approx_recip:
            inv = pl.reciprocal(denom, approx=True)                  # EUP slot
        else:
            inv = 1.0 / denom                                        # exact (f32 path)
        ctx_scr[:, lo:lo + head_dim] = (ctx_h * inv).astype(cdt)

    out = jax.lax.dot_general(ctx_scr[...], wo_ref[...], _CONTRACT_LAST,
                              preferred_element_type=jnp.float32) + bo_ref[...]
    o_ref[...] = out.astype(o_ref.dtype)


# --------------------------------------------------------------------------- #
# Wrapper.
# --------------------------------------------------------------------------- #
def cross_attention_layer(x, y, params, *, num_heads, seq_tile=None):
    """Pallas implementation of CrossAttentionLayer.forward (eval mode)."""
    # TODO(synk): optional key-padding attn_mask [b, s1] not wired in.
    b, s, qdim = x.shape
    _, s1, kdim = y.shape
    assert qdim % num_heads == 0
    head_dim = qdim // num_heads

    cdt = x.dtype
    itemsize = jnp.dtype(cdt).itemsize
    f32 = jnp.float32
    y = y.astype(cdt)

    # Weights stay in PyTorch (out_features, in_features) layout; kv_proj split
    # into K / V halves so the attention kernel never sees wkv / y at all.
    wq = params["wq"].astype(cdt)                          # (qdim, qdim)
    wk = params["wkv"][:qdim].astype(cdt)                  # (qdim, kdim)
    wv = params["wkv"][qdim:].astype(cdt)                  # (qdim, kdim)
    wo = params["wo"].astype(cdt)                          # (qdim, qdim)
    bq = params["bq"].reshape(1, qdim).astype(f32)
    bk = params["bkv"][:qdim].reshape(1, qdim).astype(f32)
    bv = params["bkv"][qdim:].reshape(1, qdim).astype(f32)
    bo = params["bo"].reshape(1, qdim).astype(f32)
    qnw = params["qn_w"].reshape(1, head_dim).astype(f32)
    qnb = params["qn_b"].reshape(1, head_dim).astype(f32)
    scale = 1.0 / math.sqrt(head_dim)          # fold attn scale into k-norm affine
    knw = (params["kn_w"] * scale).reshape(1, head_dim).astype(f32)
    knb = (params["kn_b"] * scale).reshape(1, head_dim).astype(f32)

    cap = _vmem_capacity_bytes()

    # -------------------------- call 1: KV projection + K LayerNorm ----------
    kv_est = (2 * s1 * kdim * itemsize                 # y (double-buffered)
              + 2 * qdim * kdim * itemsize             # wk + wv (single-buffered)
              + 2 * 2 * s1 * qdim * itemsize           # k_n + v outputs (2x buf)
              + 2 * s1 * qdim * 4                      # f32 K / V intermediates
              + 4 * qdim * 4 + 2 * head_dim * 4)
    kv_cost = pl.CostEstimate(
        flops=int(2 * b * s1 * kdim * 2 * qdim),
        transcendentals=int(b * s1 * num_heads),
        bytes_accessed=int(b * s1 * kdim * itemsize + 2 * qdim * kdim * itemsize
                           + 2 * b * s1 * qdim * itemsize))

    k_n, v = pl.pallas_call(
        functools.partial(_kv_proj_kernel,
                          num_heads=num_heads, head_dim=head_dim),
        out_shape=(jax.ShapeDtypeStruct((b, s1, qdim), cdt),
                   jax.ShapeDtypeStruct((b, s1, qdim), cdt)),
        grid_spec=pltpu.PrefetchScalarGridSpec(
            num_scalar_prefetch=0,
            grid=(b,),
            in_specs=[
                pl.BlockSpec((None, s1, kdim), lambda bi: (bi, 0, 0)),   # y
                _const_spec(wk.shape, 1), _const_spec(bk.shape, 1),
                _const_spec(wv.shape, 1), _const_spec(bv.shape, 1),
                _const_spec(knw.shape, 1), _const_spec(knb.shape, 1),
            ],
            out_specs=(
                pl.BlockSpec((None, s1, qdim), lambda bi: (bi, 0, 0)),   # K (normed)
                pl.BlockSpec((None, s1, qdim), lambda bi: (bi, 0, 0)),   # V
            ),
        ),
        compiler_params=pltpu.CompilerParams(
            dimension_semantics=("parallel",),
            vmem_limit_bytes=_vmem_limit(kv_est, cap)),
        cost_estimate=kv_cost,
    )(y, wk, bk, wv, bv, knw, knb)

    # -------------------------- call 2: tiled attention ----------------------
    ts = seq_tile if seq_tile is not None else _pick_seq_tile(s, cap)
    n_tiles = pl.cdiv(s, ts)

    attn_est = ((wq.size + wo.size) * itemsize          # weights (single-buffered)
                + (bq.size + bo.size + qnw.size + qnb.size) * 4
                + 2 * 2 * s1 * qdim * itemsize          # K + V (double-buffered)
                + 2 * 2 * ts * qdim * itemsize          # x + out (double-buffered)
                + ts * qdim * itemsize                  # ctx scratch (compute dtype)
                + ts * qdim * 4 + 2 * ts * s1 * 4)      # q / scores f32 temporaries
    attn_cost = pl.CostEstimate(
        flops=int(2 * b * s * (2 * qdim * qdim + 2 * s1 * qdim)),
        transcendentals=int(b * num_heads * s * (s1 + 2)),
        bytes_accessed=int(2 * b * s * qdim * itemsize
                           + 2 * b * s1 * qdim * itemsize
                           + 2 * qdim * qdim * itemsize))

    # TODO(synk): for B==1 with a single query tile on v7x, add a head-group
    # grid axis so both TensorCores stay busy.
    return pl.pallas_call(
        functools.partial(_attn_kernel, num_heads=num_heads, head_dim=head_dim,
                          approx_recip=(jnp.dtype(cdt) != jnp.float32)),
        out_shape=jax.ShapeDtypeStruct((b, s, qdim), x.dtype),
        grid_spec=pltpu.PrefetchScalarGridSpec(
            num_scalar_prefetch=0,
            grid=(b, n_tiles),
            in_specs=[
                pl.BlockSpec((None, ts, qdim), lambda bi, si: (bi, si, 0)),  # x
                pl.BlockSpec((None, s1, qdim), lambda bi, si: (bi, 0, 0)),   # K
                pl.BlockSpec((None, s1, qdim), lambda bi, si: (bi, 0, 0)),   # V
                _const_spec(wq.shape, 2), _const_spec(bq.shape, 2),
                _const_spec(qnw.shape, 2), _const_spec(qnb.shape, 2),
                _const_spec(wo.shape, 2), _const_spec(bo.shape, 2),
            ],
            out_specs=pl.BlockSpec((None, ts, qdim), lambda bi, si: (bi, si, 0)),
            scratch_shapes=[pltpu.VMEM((ts, qdim), cdt)],    # per-tile context
        ),
        compiler_params=pltpu.CompilerParams(
            dimension_semantics=("parallel", "parallel"),
            vmem_limit_bytes=_vmem_limit(attn_est, cap)),
        cost_estimate=attn_cost,
    )(x, k_n, v, wq, bq, qnw, qnb, wo, bo)


# --------------------------------------------------------------------------- #
# Pure-JAX reference mirroring the PyTorch forward (eval mode, no mask).
# --------------------------------------------------------------------------- #
def _reference(x, y, params, *, num_heads):
    b, s, qdim = x.shape
    _, s1, _ = y.shape
    hd = qdim // num_heads

    q = x @ params["wq"].T + params["bq"]
    kv = y @ params["wkv"].T + params["bkv"]
    k, v = kv[..., :qdim], kv[..., qdim:]

    def ln(t, g, bta):
        mu = t.mean(-1, keepdims=True)
        var = ((t - mu) ** 2).mean(-1, keepdims=True)
        return (t - mu) / jnp.sqrt(var + 1e-6) * g + bta

    q = ln(q.reshape(b, s, num_heads, hd), params["qn_w"], params["qn_b"])
    k = ln(k.reshape(b, s1, num_heads, hd), params["kn_w"], params["kn_b"])
    v = v.reshape(b, s1, num_heads, hd)

    scores = jnp.einsum("bqhd,bkhd->bhqk", q, k) / math.sqrt(hd)
    attn = jax.nn.softmax(scores, axis=-1)
    ctx = jnp.einsum("bhqk,bkhd->bqhd", attn, v).reshape(b, s, qdim)
    return ctx @ params["wo"].T + params["bo"]


if __name__ == "__main__":
    B, S, S1 = 2, 16, 8
    QDIM, KDIM, HEADS = 64, 48, 2

    key = jax.random.PRNGKey(0)
    ks = jax.random.split(key, 8)

    def init(k, shape, scale=0.05):
        return jax.random.normal(k, shape, dtype=jnp.float32) * scale

    params = {
        "wq": init(ks[0], (QDIM, QDIM)),
        "bq": init(ks[1], (QDIM,)),
        "wkv": init(ks[2], (2 * QDIM, KDIM)),
        "bkv": init(ks[3], (2 * QDIM,)),
        "qn_w": jnp.ones((QDIM // HEADS,), jnp.float32),
        "qn_b": jnp.zeros((QDIM // HEADS,), jnp.float32),
        "kn_w": jnp.ones((QDIM // HEADS,), jnp.float32),
        "kn_b": jnp.zeros((QDIM // HEADS,), jnp.float32),
        "wo": init(ks[4], (QDIM, QDIM)),
        "bo": init(ks[5], (QDIM,)),
    }
    x = jax.random.normal(ks[6], (B, S, QDIM), dtype=jnp.float32)
    y = jax.random.normal(ks[7], (B, S1, KDIM), dtype=jnp.float32)

    # f32 path: check against the pure-JAX reference (exact reciprocal path).
    out = jax.block_until_ready(cross_attention_layer(x, y, params, num_heads=HEADS))
    ref = _reference(x, y, params, num_heads=HEADS)
    assert out.shape == (B, S, QDIM)
    err = float(jnp.max(jnp.abs(out - ref)))
    assert jnp.allclose(out, ref, atol=5e-3, rtol=5e-3), err

    # bf16 path (recommended deployment dtype): relaxed tolerance against an
    # f32 reference built from the same bf16-rounded inputs/weights.
    to_bf16 = lambda t: t.astype(jnp.bfloat16)
    params16 = jax.tree_util.tree_map(to_bf16, params)
    x16, y16 = to_bf16(x), to_bf16(y)
    out16 = jax.block_until_ready(
        cross_attention_layer(x16, y16, params16, num_heads=HEADS))
    params16_f32 = jax.tree_util.tree_map(lambda t: t.astype(jnp.float32), params16)
    ref16 = _reference(x16.astype(jnp.float32), y16.astype(jnp.float32),
                       params16_f32, num_heads=HEADS)
    err16 = float(jnp.max(jnp.abs(out16.astype(jnp.float32) - ref16)))
    assert jnp.allclose(out16.astype(jnp.float32), ref16, atol=5e-2, rtol=5e-2), err16

    print("KERNEL_OK")
</pallas_src>

<mosaic_0001>
module attributes {stable_mosaic.version = 11 : i64} {
  func.func @_kv_proj_kernel(%arg0: i32, %arg1: memref<1x8x48xf32, #tpu.memory_space<vmem>>, %arg2: memref<64x48xf32, #tpu.memory_space<vmem>>, %arg3: memref<1x64xf32, #tpu.memory_space<vmem>>, %arg4: memref<64x48xf32, #tpu.memory_space<vmem>>, %arg5: memref<1x64xf32, #tpu.memory_space<vmem>>, %arg6: memref<1x32xf32, #tpu.memory_space<vmem>>, %arg7: memref<1x32xf32, #tpu.memory_space<vmem>>, %arg8: memref<1x8x64xf32, #tpu.memory_space<vmem>>, %arg9: memref<1x8x64xf32, #tpu.memory_space<vmem>>) attributes {dimension_semantics = [#tpu.dimension_semantics<parallel>], iteration_bounds = array<i64: 2>, scalar_prefetch = 0 : i64, scratch_operands = 0 : i64, tpu.core_type = #tpu.core_type<tc>, window_params = [{transform_indices = @transform_0, window_bounds = array<i64: 1, 8, 48>}, {pipeline_mode = #tpu.pipeline_mode<synchronous>, transform_indices = @transform_1, window_bounds = array<i64: 64, 48>}, {pipeline_mode = #tpu.pipeline_mode<synchronous>, transform_indices = @transform_2, window_bounds = array<i64: 1, 64>}, {pipeline_mode = #tpu.pipeline_mode<synchronous>, transform_indices = @transform_3, window_bounds = array<i64: 64, 48>}, {pipeline_mode = #tpu.pipeline_mode<synchronous>, transform_indices = @transform_4, window_bounds = array<i64: 1, 64>}, {pipeline_mode = #tpu.pipeline_mode<synchronous>, transform_indices = @transform_5, window_bounds = array<i64: 1, 32>}, {pipeline_mode = #tpu.pipeline_mode<synchronous>, transform_indices = @transform_6, window_bounds = array<i64: 1, 32>}, {transform_indices = @transform_7, window_bounds = array<i64: 1, 8, 64>}, {transform_indices = @transform_8, window_bounds = array<i64: 1, 8, 64>}]} {
    %c0 = arith.constant 0 : index
    %c0_0 = arith.constant 0 : index
    %c0_1 = arith.constant 0 : index
    %0 = vector.load %arg1[%c0, %c0_0, %c0_1] : memref<1x8x48xf32, #tpu.memory_space<vmem>>, vector<1x8x48xf32>
    %1 = vector.shape_cast %0 : vector<1x8x48xf32> to vector<8x48xf32>
    %c0_2 = arith.constant 0 : index
    %c0_3 = arith.constant 0 : index
    %2 = vector.load %arg4[%c0_2, %c0_3] : memref<64x48xf32, #tpu.memory_space<vmem>>, vector<64x48xf32>
    %cst = arith.constant dense<0.000000e+00> : vector<8x64xf32>
    %3 = tpu.matmul %1, %2, %cst {dimension_numbers = #tpu.dot_dimension_numbers<[1], [1], [0], [0], [0, 0, 1, 0], [], []>} : vector<8x48xf32>, vector<64x48xf32>, vector<8x64xf32> -> vector<8x64xf32>
    %c0_4 = arith.constant 0 : index
    %c0_5 = arith.constant 0 : index
    %4 = vector.load %arg5[%c0_4, %c0_5] : memref<1x64xf32, #tpu.memory_space<vmem>>, vector<1x64xf32>
    %5 = vector.broadcast %4 : vector<1x64xf32> to vector<8x64xf32>
    %6 = arith.addf %3, %5 : vector<8x64xf32>
    %c0_6 = arith.constant 0 : index
    %c0_7 = arith.constant 0 : index
    %c0_8 = arith.constant 0 : index
    %7 = vector.load %arg9[%c0_6, %c0_7, %c0_8] : memref<1x8x64xf32, #tpu.memory_space<vmem>>, vector<1x8x64xf32>
    %8 = vector.shape_cast %7 : vector<1x8x64xf32> to vector<8x64xf32>
    %9 = vector.shape_cast %6 : vector<8x64xf32> to vector<1x8x64xf32>
    tpu.vector_store %arg9[%c0_6, %c0_7, %c0_8], %9 {strides = array<i32>} : memref<1x8x64xf32, #tpu.memory_space<vmem>>, vector<1x8x64xf32>,
    %c0_9 = arith.constant 0 : index
    %c0_10 = arith.constant 0 : index
    %10 = vector.load %arg2[%c0_9, %c0_10] : memref<64x48xf32, #tpu.memory_space<vmem>>, vector<64x48xf32>
    %cst_11 = arith.constant dense<0.000000e+00> : vector<8x64xf32>
    %11 = tpu.matmul %1, %10, %cst_11 {dimension_numbers = #tpu.dot_dimension_numbers<[1], [1], [0], [0], [0, 0, 1, 0], [], []>} : vector<8x48xf32>, vector<64x48xf32>, vector<8x64xf32> -> vector<8x64xf32>
    %c0_12 = arith.constant 0 : index
    %c0_13 = arith.constant 0 : index
    %12 = vector.load %arg3[%c0_12, %c0_13] : memref<1x64xf32, #tpu.memory_space<vmem>>, vector<1x64xf32>
    %13 = vector.broadcast %12 : vector<1x64xf32> to vector<8x64xf32>
    %14 = arith.addf %11, %13 : vector<8x64xf32>
    %c0_14 = arith.constant 0 : index
    %c0_15 = arith.constant 0 : index
    %15 = vector.load %arg6[%c0_14, %c0_15] : memref<1x32xf32, #tpu.memory_space<vmem>>, vector<1x32xf32>
    %c0_16 = arith.constant 0 : index
    %c0_17 = arith.constant 0 : index
    %16 = vector.load %arg7[%c0_16, %c0_17] : memref<1x32xf32, #tpu.memory_space<vmem>>, vector<1x32xf32>
    %17 = vector.extract_strided_slice %14 {offsets = [0, 0], sizes = [8, 32], strides = [1, 1]} : vector<8x64xf32> to vector<8x32xf32>
    %cst_18 = arith.constant dense<0.000000e+00> : vector<8xf32>
    %18 = vector.multi_reduction <add>, %17, %cst_18 [1] : vector<8x32xf32> to vector<8xf32>
    %19 = vector.shape_cast %18 : vector<8xf32> to vector<8x1xf32>
    %cst_19 = arith.constant 3.200000e+01 : f32
    %20 = vector.broadcast %cst_19 : f32 to vector<8x1xf32>
    %21 = arith.divf %19, %20 : vector<8x1xf32>
    %22 = vector.broadcast %21 : vector<8x1xf32> to vector<8x32xf32>
    %23 = arith.subf %17, %22 : vector<8x32xf32>
    %24 = arith.mulf %23, %23 : vector<8x32xf32>
    %cst_20 = arith.constant dense<0.000000e+00> : vector<8xf32>
    %25 = vector.multi_reduction <add>, %24, %cst_20 [1] : vector<8x32xf32> to vector<8xf32>
    %26 = vector.shape_cast %25 : vector<8xf32> to vector<8x1xf32>
    %cst_21 = arith.constant 3.200000e+01 : f32
    %27 = vector.broadcast %cst_21 : f32 to vector<8x1xf32>
    %28 = arith.divf %26, %27 : vector<8x1xf32>
    %cst_22 = arith.constant 9.99999997E-7 : f32
    %29 = vector.broadcast %cst_22 : f32 to vector<8x1xf32>
    %30 = arith.addf %28, %29 : vector<8x1xf32>
    %31 = math.rsqrt %30 : vector<8x1xf32>
    %32 = vector.broadcast %31 : vector<8x1xf32> to vector<8x32xf32>
    %33 = arith.mulf %23, %32 : vector<8x32xf32>
    %34 = vector.broadcast %15 : vector<1x32xf32> to vector<8x32xf32>
    %35 = arith.mulf %33, %34 : vector<8x32xf32>
    %36 = vector.broadcast %16 : vector<1x32xf32> to vector<8x32xf32>
    %37 = arith.addf %35, %36 : vector<8x32xf32>
    %c0_23 = arith.constant 0 : index
    %c0_24 = arith.constant 0 : index
    %c0_25 = arith.constant 0 : index
    %38 = vector.load %arg8[%c0_23, %c0_24, %c0_25] : memref<1x8x64xf32, #tpu.memory_space<vmem>>, vector<1x8x32xf32>
    %39 = vector.shape_cast %38 : vector<1x8x32xf32> to vector<8x32xf32>
    %40 = vector.shape_cast %37 : vector<8x32xf32> to vector<1x8x32xf32>
    tpu.vector_store %arg8[%c0_23, %c0_24, %c0_25], %40 {strides = array<i32>} : memref<1x8x64xf32, #tpu.memory_space<vmem>>, vector<1x8x32xf32>,
    %41 = vector.extract_strided_slice %14 {offsets = [0, 32], sizes = [8, 32], strides = [1, 1]} : vector<8x64xf32> to vector<8x32xf32>
    %cst_26 = arith.constant dense<0.000000e+00> : vector<8xf32>
    %42 = vector.multi_reduction <add>, %41, %cst_26 [1] : vector<8x32xf32> to vector<8xf32>
    %43 = vector.shape_cast %42 : vector<8xf32> to vector<8x1xf32>
    %cst_27 = arith.constant 3.200000e+01 : f32
    %44 = vector.broadcast %cst_27 : f32 to vector<8x1xf32>
    %45 = arith.divf %43, %44 : vector<8x1xf32>
    %46 = vector.broadcast %45 : vector<8x1xf32> to vector<8x32xf32>
    %47 = arith.subf %41, %46 : vector<8x32xf32>
    %48 = arith.mulf %47, %47 : vector<8x32xf32>
    %cst_28 = arith.constant dense<0.000000e+00> : vector<8xf32>
    %49 = vector.multi_reduction <add>, %48, %cst_28 [1] : vector<8x32xf32> to vector<8xf32>
    %50 = vector.shape_cast %49 : vector<8xf32> to vector<8x1xf32>
    %cst_29 = arith.constant 3.200000e+01 : f32
    %51 = vector.broadcast %cst_29 : f32 to vector<8x1xf32>
    %52 = arith.divf %50, %51 : vector<8x1xf32>
    %cst_30 = arith.constant 9.99999997E-7 : f32
    %53 = vector.broadcast %cst_30 : f32 to vector<8x1xf32>
    %54 = arith.addf %52, %53 : vector<8x1xf32>
    %55 = math.rsqrt %54 : vector<8x1xf32>
    %56 = vector.broadcast %55 : vector<8x1xf32> to vector<8x32xf32>
    %57 = arith.mulf %47, %56 : vector<8x32xf32>
    %58 = vector.broadcast %15 : vector<1x32xf32> to vector<8x32xf32>
    %59 = arith.mulf %57, %58 : vector<8x32xf32>
    %60 = vector.broadcast %16 : vector<1x32xf32> to vector<8x32xf32>
    %61 = arith.addf %59, %60 : vector<8x32xf32>
    %c0_31 = arith.constant 0 : index
    %c0_32 = arith.constant 0 : index
    %c32 = arith.constant 32 : index
    %62 = vector.load %arg8[%c0_31, %c0_32, %c32] : memref<1x8x64xf32, #tpu.memory_space<vmem>>, vector<1x8x32xf32>
    %63 = vector.shape_cast %62 : vector<1x8x32xf32> to vector<8x32xf32>
    %64 = vector.shape_cast %61 : vector<8x32xf32> to vector<1x8x32xf32>
    tpu.vector_store %arg8[%c0_31, %c0_32, %c32], %64 {strides = array<i32>} : memref<1x8x64xf32, #tpu.memory_space<vmem>>, vector<1x8x32xf32>,
    return
  }
  func.func @transform_0(%arg0: i32) -> (i32, i32, i32) {
    %c0_i32 = arith.constant 0 : i32
    %c0_i32_0 = arith.constant 0 : i32
    %c0_i32_1 = arith.constant 0 : i32
    return %arg0, %c0_i32, %c0_i32_0 : i32, i32, i32
  }
  func.func @transform_1(%arg0: i32) -> (i32, i32) {
    %c0_i32 = arith.constant 0 : i32
    %c0_i32_0 = arith.constant 0 : i32
    %c0_i32_1 = arith.constant 0 : i32
    return %c0_i32, %c0_i32_0 : i32, i32
  }
  func.func @transform_2(%arg0: i32) -> (i32, i32) {
    %c0_i32 = arith.constant 0 : i32
    %c0_i32_0 = arith.constant 0 : i32
    %c0_i32_1 = arith.constant 0 : i32
    return %c0_i32, %c0_i32_0 : i32, i32
  }
  func.func @transform_3(%arg0: i32) -> (i32, i32) {
    %c0_i32 = arith.constant 0 : i32
    %c0_i32_0 = arith.constant 0 : i32
    %c0_i32_1 = arith.constant 0 : i32
    return %c0_i32, %c0_i32_0 : i32, i32
  }
  func.func @transform_4(%arg0: i32) -> (i32, i32) {
    %c0_i32 = arith.constant 0 : i32
    %c0_i32_0 = arith.constant 0 : i32
    %c0_i32_1 = arith.constant 0 : i32
    return %c0_i32, %c0_i32_0 : i32, i32
  }
  func.func @transform_5(%arg0: i32) -> (i32, i32) {
    %c0_i32 = arith.constant 0 : i32
    %c0_i32_0 = arith.constant 0 : i32
    %c0_i32_1 = arith.constant 0 : i32
    return %c0_i32, %c0_i32_0 : i32, i32
  }
  func.func @transform_6(%arg0: i32) -> (i32, i32) {
    %c0_i32 = arith.constant 0 : i32
    %c0_i32_0 = arith.constant 0 : i32
    %c0_i32_1 = arith.constant 0 : i32
    return %c0_i32, %c0_i32_0 : i32, i32
  }
  func.func @transform_7(%arg0: i32) -> (i32, i32, i32) {
    %c0_i32 = arith.constant 0 : i32
    %c0_i32_0 = arith.constant 0 : i32
    %c0_i32_1 = arith.constant 0 : i32
    return %arg0, %c0_i32, %c0_i32_0 : i32, i32, i32
  }
  func.func @transform_8(%arg0: i32) -> (i32, i32, i32) {
    %c0_i32 = arith.constant 0 : i32
    %c0_i32_0 = arith.constant 0 : i32
    %c0_i32_1 = arith.constant 0 : i32
    return %arg0, %c0_i32, %c0_i32_0 : i32, i32, i32
  }
}

</mosaic_0001>

<bundles_post_ra>
// kernel: tpu_custom_call.1
= control target key start
LH: loop header
LB: loop body
LE: loop exit
PB: predicated region body
PF: predicated region fallthrough
CT: control target
= control target key end

     0   :  { %s1232_s0 = inlined_call_operand.vmem [shape: f32[2,8,48], index: 0, kind: input, shape index: {}]   ;;  %s1233_s1 = inlined_call_operand.vmem [shape: f32[64,48], index: 1, kind: input, shape index: {}]   ;;  %s1234_s2 = inlined_call_operand.vmem [shape: f32[1,64], index: 2, kind: input, shape index: {}]   ;;  %s1235_s3 = inlined_call_operand.vmem [shape: f32[64,48], index: 3, kind: input, shape index: {}]   ;;  %s1236_s4 = inlined_call_operand.vmem [shape: f32[1,64], index: 4, kind: input, shape index: {}]   ;;  %s1237_s5 = inlined_call_operand.vmem [shape: f32[1,32], index: 5, kind: input, shape index: {}]   ;;  %s1238_s6 = inlined_call_operand.vmem [shape: f32[1,32], index: 6, kind: input, shape index: {}]   ;;  %s1239_s7 = inlined_call_operand.hbm [shape: f32[2,8,64], index: 7, kind: output, shape index: {0}]   ;;  %s1240_s8 = inlined_call_operand.hbm [shape: f32[2,8,64], index: 8, kind: output, shape index: {1}]  }
   0x1   :  { %1243 = sst [smem:[#allocation8_spill]] %s1232_s0 }
   0x2   :  { %14 = vsyncpa [#allocation3], 0 }
   0x3   :  { %16 = vsyncpa [#allocation3 + $0x1], 0 }
   0x4   :  { %17 = vsyncpa [#allocation5], 0 }
   0x5   :  { %19 = vsyncpa [#allocation5 + $0x1], 0  ;;  %s1009_s27 = smov 0   ;;  %s1011_s28 = smov 0  }
   0x6   :  { %s1013_s29 = smov 0   ;;  %s1015_s30 = smov 0  }
   0x7 LB: > { %s1030_s9 = sadd.s32 4294967295, %s956_s30   ;;  %s723_s10 = sadd.s32 4294967294, %s956_s30   ;;  %s956_s30 = sphi %s1015_s30, %s1252_s30   ;;  %s952_s29 = sphi %s1013_s29, %s1251_s29   ;;  %s948_s28 = sphi %s1011_s28, %s1250_s28   ;;  %s944_s27 = sphi %s1009_s27, %s1249_s27  }
   0x8   : > { %s1034_s11 = sadd.s32 1, %s956_s30   ;;  %s184_s12 = sadd.s32 1, %s952_s29 }
   0x9   : > { %s181_s13 = ssub.s32 %s956_s30, %s1034_s11  ;;  %p194_p0 = scmp.ne.s32.totalorder %s952_s29, %s948_s28 }
   0xa   : > { %p182_p1 = scmp.eq.s32.totalorder %s181_s13, 0  ;;  %p195_p2 = scmp.eq.s32.totalorder %s1030_s9, 1 }
   0xb   : > { %p200_p3 = scmp.ne.s32.totalorder %s948_s28, %s944_s27  ;;  %p201_p4 = scmp.eq.s32.totalorder %s723_s10, 1 }
   0xc   : > { %s1045_s14 = scalar_select %p182_p1, %s952_s29, %s184_s12  }
   0xd   : > { %p1047_p5 = por %p195_p2, %p194_p0  ;;  %p1051_p6 = por %p201_p4, %p200_p3 }
   0xe   : > { %p726_p7 = scmp.ge.s32.totalorder %s956_s30, 1  ;;  %p270_p8 = scmp.lt.s32.totalorder %s956_s30, 3 }
  0x10   : > { %p271_p9 = pnand %p726_p7, %p270_p8 }
  0x11   : > { %p308_p10 = scmp.lt.s32.totalorder (!%p271_p9), %s1030_s9, 1  ;;  %s1246_s0 = sld [smem:[#allocation8_spill]] (!%p271_p9) }
  0x12   : > { %274 = sbr.rel (%p271_p9) target bundleno = 802 (0x322), region = 48  ;;  %s960_s10 = smov (!%p271_p9), 96  }
  0x13   : > { %s961_s21 = smov (!%p271_p9), 32   ;;  %s1166_s23 = sand.u32 (!%p271_p9), 1, %s948_s28  }
  0x14   : > { %s1241_s26 = sshll.u32 (!%p271_p9), %s1166_s23, 3  ;;  %s1242_s12 = sshll.u32 (!%p271_p9), %s1030_s9, 7 }
  0x15   : > { %s962_s22 = smov (!%p271_p9), [#allocation4]  }
  0x17   : > { %vm328_vm0 = vcmask 392192   ;;  %v435_v0 = vld [vmem:[%s1233_s1 + $0x38] sm:$0xff]  ;;  %v958_v1 = vmov 0.0   ;;  %vm959_vm1 = vmmov 0   ;;  %v434_v2 = vld [vmem:[%s1233_s1 + $0x30] sm:$0xff]  ;;  %v433_v3 = vld [vmem:[%s1233_s1 + $0x28] sm:$0xff] }
  0x18   : > { %795 = vmatprep.subr.mxu1 %v958_v1  ;;  %811 = vmatprep.mubr.msk.f32.mxu1 %vm959_vm1, %v958_v1  ;;  %v432_v4 = vld [vmem:[%s1233_s1 + $0x20] sm:$0xff]  ;;  %v431_v5 = vld [vmem:[%s1233_s1 + $0x18] sm:$0xff]  ;;  %v430_v6 = vld [vmem:[%s1233_s1 + $0x10] sm:$0xff]  ;;  %s309_s13 = scalar_select %p308_p10, %s1030_s9, 1  ;;  %vm539_vm2 = vcmask 261120   ;;  %vm426_vm3 = vcmask 523264  }
  0x19   : > { %796 = vmatpush3.xpose.msk.msra.mxu1 %vm328_vm0, %v435_v0  ;;  %776 = vmatprep.subr.mxu0 %v958_v1  ;;  %v429_v7 = vld [vmem:[%s1233_s1 + $0x8] sm:$0xff]  ;;  %v428_v8 = vld [vmem:[%s1233_s1] sm:$0xff]  ;;  %v320_v17 = vld [vmem:[%s1235_s3 + $0x38] sm:$0xff] }
  0x1a   : > { %797 = vmatprep.subr.mxu1 %v958_v1  ;;  %792 = vmatprep.mubr.msk.f32.mxu0 %vm959_vm1, %v958_v1  ;;  %s729_s19 = sshll.u32 %s309_s13, 3  ;;  %v740_v10 = vld [vmem:[%s1234_s2] ss:$0 sm:$0xff]  ;;  %v319_v18 = vld [vmem:[%s1235_s3 + $0x30] sm:$0xff]  ;;  %v318_v19 = vld [vmem:[%s1235_s3 + $0x28] sm:$0xff]  ;;  %s307_s13 = scalar_lea.vmem [#allocation4], %s1241_s26 }
  0x1b   : > { %s311_s24 = scalar_lea.vmem %s1246_s0, %s729_s19  ;;  %777 = vmatpush3.xpose.msk.msra.mxu0 %vm328_vm0, %v320_v17  ;;  %v317_v20 = vld [vmem:[%s1235_s3 + $0x20] sm:$0xff]  ;;  %v316_v21 = vld [vmem:[%s1235_s3 + $0x18] sm:$0xff]  ;;  %v315_v22 = vld [vmem:[%s1235_s3 + $0x10] sm:$0xff]  ;;  %s630_s19 = scalar_lea.hbm %s1240_s8, %s1242_s12 }
  0x1c   : > { %v312_v9 = vld [vmem:[%s311_s24] sm:$0xff]  ;;  %778 = vmatprep.subr.mxu0 %v958_v1  ;;  %v314_v23 = vld [vmem:[%s1235_s3 + $0x8] sm:$0xff]  ;;  %s632_s20 = sshll.u32 %s307_s13, 4  ;;  %s870_s24 = sshll.u32 %s962_s22, 4  ;;  %s633_s20 = int_to_ptr.vmem [resolvable:$true] %s632_s20  ;;  %s871_s24 = int_to_ptr.vmem [resolvable:$false] %s870_s24 }
  0x1d   : > { %798 = vmatpush3.xpose.msk.msra.mxu1 %vm328_vm0, %v434_v2  ;;  %v313_v24 = vld [vmem:[%s1235_s3] sm:$0xff]  ;;  %s872_s25 = scalar_lea.vmem %s871_s24, 256  ;;  %p873_p0 = scmp.lt.s32.totalorder %s633_s20, %s871_s24 }
  0x1e   : > { %799 = vmatprep.subr.mxu1 %v958_v1  ;;  %v751_v34 = vld [vmem:[%s1238_s6] ss:$0 sm:$0xff] }
  0x1f   : > { %779 = vmatpush3.xpose.msk.msra.mxu0 %vm328_vm0, %v319_v18  ;;  %v750_v37 = vld [vmem:[%s1237_s5] ss:$0 sm:$0xff] }
  0x20   : > { %780 = vmatprep.subr.mxu0 %v958_v1  ;;  %v730_v39 = vld [vmem:[%s1236_s4] ss:$0 sm:$0xff] }
  0x21   : > { %800 = vmatpush3.xpose.msk.msra.mxu1 %vm328_vm0, %v433_v3 }
  0x22   : > { %801 = vmatprep.subr.mxu1 %v958_v1 }
  0x23   : > { %781 = vmatpush3.xpose.msk.msra.mxu0 %vm328_vm0, %v318_v19 }
  0x24   : > { %782 = vmatprep.subr.mxu0 %v958_v1 }
  0x25   : > { %802 = vmatpush3.xpose.msk.msra.mxu1 %vm328_vm0, %v432_v4 }
  0x26   : > { %803 = vmatprep.subr.mxu1 %v958_v1 }
  0x27   : > { %783 = vmatpush3.xpose.msk.msra.mxu0 %vm328_vm0, %v317_v20 }
  0x28   : > { %784 = vmatprep.subr.mxu0 %v958_v1 }
  0x29   : > { %804 = vmatpush3.xpose.msk.msra.mxu1 %vm328_vm0, %v431_v5 }
  0x2a   : > { %805 = vmatprep.subr.mxu1 %v958_v1 }
  0x2b   : > { %785 = vmatpush3.xpose.msk.msra.mxu0 %vm328_vm0, %v316_v21 }
  0x2c   : > { %786 = vmatprep.subr.mxu0 %v958_v1 }
  0x2d   : > { %806 = vmatpush3.xpose.msk.msra.mxu1 %vm328_vm0, %v430_v6 }
  0x2e   : > { %807 = vmatprep.subr.mxu1 %v958_v1 }
  0x2f   : > { %787 = vmatpush3.xpose.msk.msra.mxu0 %vm328_vm0, %v315_v22 }
  0x30   : > { %788 = vmatprep.subr.mxu0 %v958_v1 }
  0x31   : > { %808 = vmatpush3.xpose.msk.msra.mxu1 %vm328_vm0, %v429_v7 }
  0x32   : > { %809 = vmatprep.subr.mxu1 %v958_v1 }
  0x33   : > { %789 = vmatpush3.xpose.msk.msra.mxu0 %vm328_vm0, %v314_v23 }
  0x34   : > { %790 = vmatprep.subr.mxu0 %v958_v1 }
  0x35   : > { %810 = vmatpush3.xpose.msk.msra.mxu1 %vm328_vm0, %v428_v8 }
  0x37   : > { %791 = vmatpush3.xpose.msk.msra.mxu0 %vm328_vm0, %v313_v24 }
  0x38   : > { %812 = vmatmul.mubr.msk.f32.vlgmr.msra.gmra.mxu1 %vm328_vm0, %v312_v9 }
  0x3a   : > { %793 = vmatmul.mubr.msk.f32.vlgmr.msra.gmra.mxu0 %vm328_vm0, %v312_v9 }
  0xf8   : > { %v533_v11 = vpop.f32.mrf.mxu1 }
  0xf9   : > { %v534_v12 = vadd.f32 %v740_v10, %v533_v11 }
  0xfa   : > { %v813_v13 = vpop.f32.mrf.mxu1  ;;  %v422_v38 = vpop.f32.mrf.mxu0 }
  0xfb   : > { %570 = vrot.lane.b32.xlu0 %v534_v12, %s960_s10  ;;  %v540_v14 = vsel %vm539_vm2, %v534_v12, 0.0  ;;  %v423_v40 = vadd.f32 %v730_v39, %v422_v38 }
  0xfc   : > { %541 = vadd.xlane.f32.xlu1 %v540_v14  ;;  %v794_v41 = vpop.f32.mrf.mxu0 }
  0xfd   : > { %427 = vst.msk [vmem:[%s307_s13] sm:$0xff] %vm426_vm3, %v423_v40 }
 0x16d   : > { %v571_v15 = vpop.permute.xlu0 %570 }
 0x16e   : > { %v573_v16 = vsel %vm539_vm2, %v571_v15, 0.0 }
 0x16f   : > { %574 = vadd.xlane.f32.xlu0 %v573_v16 }
 0x185   : > { %v542_v29 = vpop.xlane.xlu1 %541 }
 0x186   : > { %v544_v30 = vmul.f32 0.03125, %v542_v29 }
 0x188   : > { %v545_v31 = vsub.f32 %v534_v12, %v544_v30 }
 0x18a   : > { %v546_v32 = vmul.f32 %v545_v31, %v545_v31 }
 0x18c   : > { %v547_v33 = vsel %vm539_vm2, %v546_v32, 0.0 }
 0x1f8   : > { %v575_v25 = vpop.xlane.xlu0 %574 }
 0x1f9   : > { %v576_v26 = vmul.f32 0.03125, %v575_v25 }
 0x1fb   : > { %v1152_v27 = vsub.f32 %v534_v12, %v576_v26 }
 0x1fd   : > { %v578_v28 = vmul.f32 %v1152_v27, %v1152_v27 }
 0x1ff   : > { %580 = vrot.lane.b32.xlu1 %v578_v28, %s960_s10  ;;  %s866_s10 = scalar_lea.vmem %s633_s20, 128 }
 0x200   : > { %p867_p11 = scmp.ne.s32.totalorder %s633_s20, %s866_s10  ;;  %p874_p1 = scmp.lt.s32.totalorder %s872_s25, %s866_s10 }
 0x202   : > { %p868_p12 = pnand %p867_p11, %p1047_p5  ;;  %p875_p2 = por %p874_p1, %p873_p0 }
 0x204   : > { %p869_p13 = pneg %p868_p12 }
 0x206   : > { %p876_p3 = pnand %p875_p2, %p869_p13 }
 0x223   : > { %548 = vadd.xlane.f32.xlu1 %v547_v33 }
 0x234   : > { %594 = vrot.lane.b32.xlu1 %v751_v34, %s961_s21 }
 0x271   : > { %v581_v35 = vpop.permute.xlu1 %580 }
 0x272   : > { %v583_v36 = vsel %vm539_vm2, %v581_v35, 0.0 }
 0x273   : > { %584 = vadd.xlane.f32.xlu0 %v583_v36 }
 0x289   : > { %590 = vrot.lane.b32.xlu0 %v750_v37, %s961_s21  ;;  %s606_s21 = scalar_lea.sflag [#allocation5], %s1166_s23 }
 0x28a   : > { %879 = shalt.err (!%p876_p3)
}
 0x28b   : > { %s880_s26 = scalar_lea.hbm %s630_s19, 128  ;;  %s884_s18 = scalar_lea.hbm %s1240_s8, 256 }
 0x28c   : > { %p881_p4 = scmp.ne.s32.totalorder %s630_s19, %s880_s26  ;;  %p885_p9 = scmp.lt.s32.totalorder %s630_s19, %s1240_s8 }
 0x28d   : > { %p886_p10 = scmp.lt.s32.totalorder %s884_s18, %s880_s26 }
 0x28e   : > { %p882_p7 = pnand %p881_p4, %p1047_p5 }
 0x28f   : > { %p887_p11 = por %p886_p10, %p885_p9 }
 0x290   : > { %p883_p8 = pneg %p882_p7 }
 0x292   : > { %p888_p12 = pnand %p887_p11, %p883_p8 }
 0x294   : > { %891 = shalt.err (!%p888_p12)
}
 0x295   : > { %815 = dma.vmem_to_hbm [thread:$0]  (%p1047_p5), %s633_s20, 128, %s630_s19, %s606_s21   ;;  %vm598_vm4 = vcmask 523520  }
 0x296   : > { %s1247_s10 = sshll.u32 %s1166_s23, 3  ;;  %s1248_s12 = sshll.u32 %s1030_s9, 7 }
 0x297   : > { %s300_s0 = scalar_lea.vmem [#allocation2], %s1247_s10  ;;  %s617_s21 = scalar_lea.hbm %s1239_s7, %s1248_s12 }
 0x298   : > { %s619_s26 = sshll.u32 %s300_s0, 4  ;;  %s601_s22 = scalar_lea.sflag [#allocation3], %s1166_s23  ;;  %s620_s26 = int_to_ptr.vmem [resolvable:$true] %s619_s26 }
 0x299   : > { %s892_s24 = scalar_lea.vmem %s620_s26, 128  ;;  %s963_s25 = smov [#allocation2]  }
 0x29a   : > { %p893_p13 = scmp.ne.s32.totalorder %s620_s26, %s892_s24  ;;  %s896_s13 = sshll.u32 %s963_s25, 4  ;;  %s897_s13 = int_to_ptr.vmem [resolvable:$false] %s896_s13 }
 0x29b   : > { %s898_s17 = scalar_lea.vmem %s897_s13, 256  ;;  %p899_p2 = scmp.lt.s32.totalorder %s620_s26, %s897_s13 }
 0x29c   : > { %p894_p0 = pnand %p893_p13, %p1047_p5  ;;  %p900_p3 = scmp.lt.s32.totalorder %s898_s17, %s892_s24 }
 0x29e   : > { %p895_p1 = pneg %p894_p0  ;;  %p901_p4 = por %p900_p3, %p899_p2 }
 0x2a0   : > { %p902_p7 = pnand %p901_p4, %p895_p1 }
 0x2ac   : > { %v549_v42 = vpop.xlane.xlu1 %548 }
 0x2ad   : > { %v550_v43 = vmul.f32 0.03125, %v549_v42 }
 0x2af   : > { %v551_v44 = vadd.f32 1e-06, %v550_v43 }
 0x2b0   : > { %v595_v55 = vpop.permute.xlu1 %594 }
 0x2b1   : > { %862 = vrsqrt.f32 %v551_v44 }
 0x2be   : > { %v863_v45 = vpop.eup %862 }
 0x2bf   : > { %v553_v46 = vmul.f32 %v863_v45, %v545_v31 }
 0x2c1   : > { %v560_v47 = vmul.f32 %v750_v37, %v553_v46 }
 0x2c3   : > { %v567_v48 = vadd.f32 %v751_v34, %v560_v47 }
 0x2c5   : > { %568 = vst.msk [vmem:[%s300_s0] sm:$0xff] %vm539_vm2, %v567_v48 }
 0x2fc   : > { %v585_v49 = vpop.xlane.xlu0 %584 }
 0x2fd   : > { %v586_v50 = vmul.f32 0.03125, %v585_v49 }
 0x2ff   : > { %v587_v51 = vadd.f32 1e-06, %v586_v50 }
 0x300   : > { %v591_v53 = vpop.permute.xlu0 %590 }
 0x301   : > { %864 = vrsqrt.f32 %v587_v51 }
 0x30e   : > { %v865_v52 = vpop.eup %864 }
 0x30f   : > { %v589_v54 = vmul.f32 %v865_v52, %v1152_v27 }
 0x311   : > { %v593_v56 = vmul.f32 %v591_v53, %v589_v54 }
 0x313   : > { %v597_v57 = vadd.f32 %v595_v55, %v593_v56 }
 0x315   : > { %599 = vst.msk [vmem:[%s300_s0] sm:$0xff] %vm598_vm4, %v597_v57 }
 0x316   : > { %905 = shalt.err (!%p902_p7)
}
 0x317   : > { %s906_s9 = scalar_lea.hbm %s617_s21, 128  ;;  %s910_s10 = scalar_lea.hbm %s1239_s7, 256 }
 0x318   : > { %p907_p8 = scmp.ne.s32.totalorder %s617_s21, %s906_s9  ;;  %p911_p11 = scmp.lt.s32.totalorder %s617_s21, %s1239_s7 }
 0x319   : > { %p912_p12 = scmp.lt.s32.totalorder %s910_s10, %s906_s9 }
 0x31a   : > { %p908_p9 = pnand %p907_p8, %p1047_p5 }
 0x31b   : > { %p913_p13 = por %p912_p12, %p911_p11 }
 0x31c   : > { %p909_p10 = pneg %p908_p9 }
 0x31e   : > { %p914_p0 = pnand %p913_p13, %p909_p10 }
 0x320   : > { %917 = shalt.err (!%p914_p0)
}
 0x321   : > { %814 = dma.vmem_to_hbm [thread:$0]  (%p1047_p5), %s620_s26, 128, %s617_s21, %s601_s22  }
 0x322 PF: > { %p825_p1 = scmp.ge.s32.totalorder %s956_s30, 2  ;;  %s644_s19 = sand.u32 1, %s944_s27  }
 0x323   : > { %s645_s20 = scalar_lea.sflag [#allocation3], %s644_s19 }
 0x324   : > { %p819_p2 = pnand %p825_p1, %p1051_p6 }
 0x326   : > { %p820_p3 = pneg %p819_p2 }
 0x328   : > { %935 = dma.done.wait (%p820_p3), %s645_s20, 128  }
 0x329   : > { %937 = vsyncadd (%p820_p3), %s645_s20, 4294967168  ;;  %s654_s24 = scalar_lea.sflag [#allocation5], %s644_s19 }
 0x32a   : > { %939 = dma.done.wait (%p820_p3), %s654_s24, 128  }
 0x32b   : > { %941 = vsyncadd (%p820_p3), %s654_s24, 4294967168  ;;  %p22_p5 = scmp.ge.s32.totalorder %s1034_s11, 4   ;;  %s1249_s27 = smov %s948_s28 }
 0x32c   : > { %s1250_s28 = smov %s952_s29  ;;  %s1251_s29 = smov %s1045_s14 }
 0x32d   : > { %s1252_s30 = smov %s1034_s11  ;;  %24 = sbr.rel (!%p22_p5) target bundleno = 7 (0x7), region = 100 }
 0x332   :  { %659 = vsyncpa [#allocation3], 1 }
 0x333   :  { %661 = vsyncpa [#allocation3 + $0x1], 1 }
 0x334   :  { %662 = vsyncpa [#allocation5], 1 }
 0x335   :  { %664 = vsyncpa [#allocation5 + $0x1], 1 }

</bundles_post_ra>
